<compile_context>
chip_gen: v7x
topology: tpu7x:2x2x1
jax: 0.10.0
libtpu: 0.0.40
codegen_flags: <defaults>
</compile_context>

<pallas_src>
import math
import functools

import jax
import jax.numpy as jnp
from jax.experimental import pallas as pl
from jax.experimental.pallas import tpu as pltpu


# ----------------------------------------------------------------------------
# helpers
# ----------------------------------------------------------------------------

def _pick_tile(m, target=256):
    """Largest row tile <= target that divides m (keeps the sublane dim a
    multiple of 8 or the full extent, satisfying the (8,128) constraint)."""
    if m <= target:
        return m
    for t in (target, 128, 64, 32, 16, 8):
        if m % t == 0:
            return t
    return m


_PARALLEL_1D = pltpu.CompilerParams(dimension_semantics=("parallel",))


def _softmax_attention(q, k, v, bias, nhead):
    """q: (T, D) already scaled, k/v: (S, D), bias: (T, S) additive.
    Returns (merged attn output (T, D) f32, summed head weights (T, S) f32)."""
    T, D = q.shape
    S = k.shape[0]
    Dh = D // nhead
    dim_nums = (((1,), (1,)), ((), ()))        # contract last dims: (T,Dh)x(S,Dh)->(T,S)
    outs = []
    wsum = jnp.zeros((T, S), jnp.float32)
    for h in range(nhead):                     # static unroll over heads
        qh = q[:, h * Dh:(h + 1) * Dh]
        kh = k[:, h * Dh:(h + 1) * Dh]
        vh = v[:, h * Dh:(h + 1) * Dh]
        s = jax.lax.dot_general(qh, kh, dim_nums,
                                preferred_element_type=jnp.float32) + bias
        m = jnp.max(s, axis=-1, keepdims=True)
        p = jnp.exp(s - m)
        denom = jnp.sum(p, axis=-1, keepdims=True)
        # TODO(synk): fully-masked rows (all keys padded) give denom==0 -> NaN,
        # matching PyTorch's behaviour; not special-cased here.
        w = p * pl.reciprocal(denom, approx=True)
        wsum = wsum + w
        outs.append(jnp.dot(w, vh, preferred_element_type=jnp.float32))
    return jnp.concatenate(outs, axis=-1), wsum


def _out_proj_add_ln(attn, wo, bo, residual, gamma, beta, eps):
    """LayerNorm(attn @ wo + bo + residual); all f32 in VMEM."""
    y = jnp.dot(attn, wo, preferred_element_type=jnp.float32) + bo + residual
    mu = jnp.mean(y, axis=-1, keepdims=True)
    var = jnp.mean((y - mu) ** 2, axis=-1, keepdims=True)
    yn = (y - mu) * jax.lax.rsqrt(var + eps)
    return yn * gamma + beta


# ----------------------------------------------------------------------------
# Fused self-attention block kernel (per batch element)
#   y = LN(MHA(x, x, x) @ Wo + bo + x),  wavg = mean_h softmax(...)
# ----------------------------------------------------------------------------

def _self_attn_block_kernel(x_ref, wqkv_ref, bqkv_ref, bias_ref,
                            wo_ref, bo_ref, g_ref, be_ref,
                            y_ref, wavg_ref, *, nhead, scale, eps):
    D = x_ref.shape[2]
    x = x_ref[0].astype(jnp.float32)                         # (T, D)
    qkv = jnp.dot(x, wqkv_ref[...],
                  preferred_element_type=jnp.float32) + bqkv_ref[...]
    q = qkv[:, :D] * scale                                   # scale folded once
    k = qkv[:, D:2 * D]
    v = qkv[:, 2 * D:]
    bias = bias_ref[0].astype(jnp.float32)                   # (T, T) additive

    attn, wsum = _softmax_attention(q, k, v, bias, nhead)
    out = _out_proj_add_ln(attn, wo_ref[...], bo_ref[...], x,
                           g_ref[...], be_ref[...], eps)
    y_ref[0] = out.astype(y_ref.dtype)
    wavg_ref[0] = (wsum * (1.0 / nhead)).astype(wavg_ref.dtype)


def self_attn_block(x, p, gamma, beta, nhead, bias, eps=1e-5):
    """x: (B, T, D), bias: (B, T, T). Returns (y (B,T,D), wavg (B,T,T))."""
    B, T, D = x.shape
    scale = 1.0 / math.sqrt(D // nhead)
    return pl.pallas_call(
        functools.partial(_self_attn_block_kernel,
                          nhead=nhead, scale=scale, eps=eps),
        out_shape=(jax.ShapeDtypeStruct((B, T, D), x.dtype),
                   jax.ShapeDtypeStruct((B, T, T), jnp.float32)),
        grid=(B,),
        in_specs=[
            pl.BlockSpec((1, T, D), lambda b: (b, 0, 0)),
            pl.BlockSpec((D, 3 * D), lambda b: (0, 0)),
            pl.BlockSpec((1, 3 * D), lambda b: (0, 0)),
            pl.BlockSpec((1, T, T), lambda b: (b, 0, 0)),
            pl.BlockSpec((D, D), lambda b: (0, 0)),
            pl.BlockSpec((1, D), lambda b: (0, 0)),
            pl.BlockSpec((1, D), lambda b: (0, 0)),
            pl.BlockSpec((1, D), lambda b: (0, 0)),
        ],
        out_specs=(pl.BlockSpec((1, T, D), lambda b: (b, 0, 0)),
                   pl.BlockSpec((1, T, T), lambda b: (b, 0, 0))),
        compiler_params=_PARALLEL_1D,
    )(x, p["w_qkv"], p["b_qkv"].reshape(1, -1), bias,
      p["wo"], p["bo"].reshape(1, -1),
      gamma.reshape(1, -1), beta.reshape(1, -1))


# ----------------------------------------------------------------------------
# Fused cross-attention block kernel (per batch element)
#   y = LN(MHA(x, mem, mem) @ Wo + bo + x)
# ----------------------------------------------------------------------------

def _cross_attn_block_kernel(x_ref, mem_ref, wq_ref, bq_ref, wkv_ref, bkv_ref,
                             bias_ref, wo_ref, bo_ref, g_ref, be_ref,
                             y_ref, wavg_ref, *, nhead, scale, eps):
    D = x_ref.shape[2]
    x = x_ref[0].astype(jnp.float32)                          # (T, D)
    mem = mem_ref[0].astype(jnp.float32)                      # (S, D)
    q = (jnp.dot(x, wq_ref[...],
                 preferred_element_type=jnp.float32) + bq_ref[...]) * scale
    kv = jnp.dot(mem, wkv_ref[...],
                 preferred_element_type=jnp.float32) + bkv_ref[...]
    k = kv[:, :D]
    v = kv[:, D:]
    bias = bias_ref[0].astype(jnp.float32)                    # (T, S) additive

    attn, wsum = _softmax_attention(q, k, v, bias, nhead)
    out = _out_proj_add_ln(attn, wo_ref[...], bo_ref[...], x,
                           g_ref[...], be_ref[...], eps)
    y_ref[0] = out.astype(y_ref.dtype)
    wavg_ref[0] = (wsum * (1.0 / nhead)).astype(wavg_ref.dtype)


def cross_attn_block(x, memory, p, gamma, beta, nhead, bias, eps=1e-5):
    """x: (B, T, D), memory: (B, S, D), bias: (B, T, S)."""
    B, T, D = x.shape
    S = memory.shape[1]
    scale = 1.0 / math.sqrt(D // nhead)
    return pl.pallas_call(
        functools.partial(_cross_attn_block_kernel,
                          nhead=nhead, scale=scale, eps=eps),
        out_shape=(jax.ShapeDtypeStruct((B, T, D), x.dtype),
                   jax.ShapeDtypeStruct((B, T, S), jnp.float32)),
        grid=(B,),
        in_specs=[
            pl.BlockSpec((1, T, D), lambda b: (b, 0, 0)),
            pl.BlockSpec((1, S, D), lambda b: (b, 0, 0)),
            pl.BlockSpec((D, D), lambda b: (0, 0)),
            pl.BlockSpec((1, D), lambda b: (0, 0)),
            pl.BlockSpec((D, 2 * D), lambda b: (0, 0)),
            pl.BlockSpec((1, 2 * D), lambda b: (0, 0)),
            pl.BlockSpec((1, T, S), lambda b: (b, 0, 0)),
            pl.BlockSpec((D, D), lambda b: (0, 0)),
            pl.BlockSpec((1, D), lambda b: (0, 0)),
            pl.BlockSpec((1, D), lambda b: (0, 0)),
            pl.BlockSpec((1, D), lambda b: (0, 0)),
        ],
        out_specs=(pl.BlockSpec((1, T, D), lambda b: (b, 0, 0)),
                   pl.BlockSpec((1, T, S), lambda b: (b, 0, 0))),
        compiler_params=_PARALLEL_1D,
    )(x, memory, p["wq"], p["bq"].reshape(1, -1),
      p["w_kv"], p["b_kv"].reshape(1, -1), bias,
      p["wo"], p["bo"].reshape(1, -1),
      gamma.reshape(1, -1), beta.reshape(1, -1))


# ----------------------------------------------------------------------------
# Fused feed-forward block kernel (tiled over rows)
#   y = LN(relu(x @ w1 + b1) @ w2 + b2 + x)
# ----------------------------------------------------------------------------

def _ffn_block_kernel(x_ref, w1_ref, b1_ref, w2_ref, b2_ref, g_ref, be_ref,
                      o_ref, *, eps):
    x = x_ref[...].astype(jnp.float32)
    h = jnp.dot(x, w1_ref[...], preferred_element_type=jnp.float32) + b1_ref[...]
    h = jnp.maximum(h, 0.0)
    y = jnp.dot(h, w2_ref[...], preferred_element_type=jnp.float32) + b2_ref[...]
    y = y + x
    mu = jnp.mean(y, axis=-1, keepdims=True)
    var = jnp.mean((y - mu) ** 2, axis=-1, keepdims=True)
    yn = (y - mu) * jax.lax.rsqrt(var + eps)
    o_ref[...] = (yn * g_ref[...] + be_ref[...]).astype(o_ref.dtype)


def ffn_block(x, w1, b1, w2, b2, gamma, beta, eps=1e-5, tm_target=256):
    """x: (M, D). Full FFN block with the (M, FF) intermediate kept in VMEM."""
    M, D = x.shape
    FF = w1.shape[1]
    tm = _pick_tile(M, tm_target)
    return pl.pallas_call(
        functools.partial(_ffn_block_kernel, eps=eps),
        out_shape=jax.ShapeDtypeStruct((M, D), x.dtype),
        grid=(M // tm,),
        in_specs=[
            pl.BlockSpec((tm, D), lambda i: (i, 0)),
            pl.BlockSpec((D, FF), lambda i: (0, 0)),
            pl.BlockSpec((1, FF), lambda i: (0, 0)),
            pl.BlockSpec((FF, D), lambda i: (0, 0)),
            pl.BlockSpec((1, D), lambda i: (0, 0)),
            pl.BlockSpec((1, D), lambda i: (0, 0)),
            pl.BlockSpec((1, D), lambda i: (0, 0)),
        ],
        out_specs=pl.BlockSpec((tm, D), lambda i: (i, 0)),
        compiler_params=_PARALLEL_1D,
    )(x, w1, b1.reshape(1, -1), w2, b2.reshape(1, -1),
      gamma.reshape(1, -1), beta.reshape(1, -1))


# ----------------------------------------------------------------------------
# Decoder layer / decoder stack
# ----------------------------------------------------------------------------

def decoder_layer(tgt, memory, lp, nhead, tgt_bias, mem_bias):
    B, T, D = tgt.shape
    # self-attention block (fully fused: QKV, attn, out-proj, residual, LN)
    x, sa_w = self_attn_block(tgt, lp["self_attn"], lp["ln1_g"], lp["ln1_b"],
                              nhead, tgt_bias)
    # cross-attention block (fully fused)
    x2, ca_w = cross_attn_block(x, memory, lp["cross_attn"],
                                lp["ln2_g"], lp["ln2_b"], nhead, mem_bias)
    # feed-forward block (fully fused)
    out = ffn_block(x2.reshape(B * T, D), lp["w1"], lp["b1"],
                    lp["w2"], lp["b2"], lp["ln3_g"], lp["ln3_b"]
                    ).reshape(B, T, D)
    return out, sa_w, ca_w


def build_bias(B, T, S, attn_mask=None, key_padding_mask=None,
               dtype=jnp.float32):
    """Fold additive attn_mask (T, S) and boolean key_padding_mask (B, S)
    (True = pad) into a per-batch additive bias (B, T, S)."""
    bias = jnp.zeros((B, T, S), dtype)
    if attn_mask is not None:
        bias = bias + attn_mask[None, :, :].astype(dtype)
    if key_padding_mask is not None:
        bias = bias + jnp.where(key_padding_mask[:, None, :],
                                jnp.asarray(-1e9, dtype),
                                jnp.asarray(0.0, dtype))
    return bias


def custom_transformer_decoder(tgt, memory, params, nhead,
                               tgt_mask=None, memory_mask=None,
                               tgt_key_padding_mask=None,
                               memory_key_padding_mask=None):
    """Mirrors CustomTransformerDecoder.forward: returns
    (output, self_attn_weights_list, enc_dec_attn_weights_list)."""
    B, T, _ = tgt.shape
    S = memory.shape[1]
    tgt_bias = build_bias(B, T, T, tgt_mask, tgt_key_padding_mask)
    mem_bias = build_bias(B, T, S, memory_mask, memory_key_padding_mask)

    output = tgt
    self_attn_weights_list = []
    enc_dec_attn_weights_list = []
    for lp in params["layers"]:
        output, sa_w, ca_w = decoder_layer(output, memory, lp, nhead,
                                           tgt_bias, mem_bias)
        self_attn_weights_list.append(sa_w)
        enc_dec_attn_weights_list.append(ca_w)
    return output, self_attn_weights_list, enc_dec_attn_weights_list


# ----------------------------------------------------------------------------
# Deterministic parameter init
# ----------------------------------------------------------------------------

def _init_self_attn(key, d):
    ks = jax.random.split(key, 2)
    s = 0.02
    return {
        "w_qkv": s * jax.random.normal(ks[0], (d, 3 * d), jnp.float32),
        "b_qkv": jnp.zeros((3 * d,), jnp.float32),
        "wo": s * jax.random.normal(ks[1], (d, d), jnp.float32),
        "bo": jnp.zeros((d,), jnp.float32),
    }


def _init_cross_attn(key, d):
    ks = jax.random.split(key, 3)
    s = 0.02
    return {
        "wq": s * jax.random.normal(ks[0], (d, d), jnp.float32),
        "bq": jnp.zeros((d,), jnp.float32),
        "w_kv": s * jax.random.normal(ks[1], (d, 2 * d), jnp.float32),
        "b_kv": jnp.zeros((2 * d,), jnp.float32),
        "wo": s * jax.random.normal(ks[2], (d, d), jnp.float32),
        "bo": jnp.zeros((d,), jnp.float32),
    }


def init_decoder_params(key, num_layers, d_model, dim_ff):
    layers = []
    for li in range(num_layers):
        lk = jax.random.fold_in(key, li)
        ks = jax.random.split(lk, 4)
        s = 0.02
        layers.append({
            "self_attn": _init_self_attn(ks[0], d_model),
            "cross_attn": _init_cross_attn(ks[1], d_model),
            "w1": s * jax.random.normal(ks[2], (d_model, dim_ff), jnp.float32),
            "b1": jnp.zeros((dim_ff,), jnp.float32),
            "w2": s * jax.random.normal(ks[3], (dim_ff, d_model), jnp.float32),
            "b2": jnp.zeros((d_model,), jnp.float32),
            "ln1_g": jnp.ones((d_model,), jnp.float32),
            "ln1_b": jnp.zeros((d_model,), jnp.float32),
            "ln2_g": jnp.ones((d_model,), jnp.float32),
            "ln2_b": jnp.zeros((d_model,), jnp.float32),
            "ln3_g": jnp.ones((d_model,), jnp.float32),
            "ln3_b": jnp.zeros((d_model,), jnp.float32),
        })
    return {"layers": layers}


# ----------------------------------------------------------------------------
# Example run
# ----------------------------------------------------------------------------

if __name__ == "__main__":
    B, T, S = 2, 8, 8          # batch, target seq, memory seq
    D, NHEAD, FF = 32, 4, 64   # model dim, heads, feed-forward dim
    NUM_LAYERS = 2

    root = jax.random.PRNGKey(0)
    k_tgt, k_mem, k_par = jax.random.split(root, 3)

    tgt = jax.random.normal(k_tgt, (B, T, D), jnp.float32)
    memory = jax.random.normal(k_mem, (B, S, D), jnp.float32)
    params = init_decoder_params(k_par, NUM_LAYERS, D, FF)

    # causal target mask (additive: 0 on/below diag, -1e9 above)
    causal = jnp.where(jnp.tril(jnp.ones((T, T), jnp.bool_)), 0.0, -1e9)

    out, sa_list, ca_list = custom_transformer_decoder(
        tgt, memory, params, NHEAD, tgt_mask=causal)

    out = jax.block_until_ready(out)
    for w in sa_list + ca_list:
        jax.block_until_ready(w)

    assert out.shape == (B, T, D)
    assert len(sa_list) == NUM_LAYERS and len(ca_list) == NUM_LAYERS
    assert sa_list[0].shape == (B, T, T)
    assert ca_list[0].shape == (B, T, S)
    assert bool(jnp.all(jnp.isfinite(out)))
    print("KERNEL_OK")
</pallas_src>

<mosaic_0001>
module attributes {stable_mosaic.version = 11 : i64} {
  func.func @_self_attn_block_kernel(%arg0: i32, %arg1: memref<1x8x32xf32, #tpu.memory_space<vmem>>, %arg2: memref<32x96xf32, #tpu.memory_space<vmem>>, %arg3: memref<1x96xf32, #tpu.memory_space<vmem>>, %arg4: memref<1x8x8xf32, #tpu.memory_space<vmem>>, %arg5: memref<32x32xf32, #tpu.memory_space<vmem>>, %arg6: memref<1x32xf32, #tpu.memory_space<vmem>>, %arg7: memref<1x32xf32, #tpu.memory_space<vmem>>, %arg8: memref<1x32xf32, #tpu.memory_space<vmem>>, %arg9: memref<1x8x32xf32, #tpu.memory_space<vmem>>, %arg10: memref<1x8x8xf32, #tpu.memory_space<vmem>>) attributes {dimension_semantics = [#tpu.dimension_semantics<parallel>], iteration_bounds = array<i64: 2>, scalar_prefetch = 0 : i64, scratch_operands = 0 : i64, tpu.core_type = #tpu.core_type<tc>, window_params = [{transform_indices = @transform_0, window_bounds = array<i64: 1, 8, 32>}, {pipeline_mode = #tpu.pipeline_mode<synchronous>, transform_indices = @transform_1, window_bounds = array<i64: 32, 96>}, {pipeline_mode = #tpu.pipeline_mode<synchronous>, transform_indices = @transform_2, window_bounds = array<i64: 1, 96>}, {transform_indices = @transform_3, window_bounds = array<i64: 1, 8, 8>}, {pipeline_mode = #tpu.pipeline_mode<synchronous>, transform_indices = @transform_4, window_bounds = array<i64: 32, 32>}, {pipeline_mode = #tpu.pipeline_mode<synchronous>, transform_indices = @transform_5, window_bounds = array<i64: 1, 32>}, {pipeline_mode = #tpu.pipeline_mode<synchronous>, transform_indices = @transform_6, window_bounds = array<i64: 1, 32>}, {pipeline_mode = #tpu.pipeline_mode<synchronous>, transform_indices = @transform_7, window_bounds = array<i64: 1, 32>}, {transform_indices = @transform_8, window_bounds = array<i64: 1, 8, 32>}, {transform_indices = @transform_9, window_bounds = array<i64: 1, 8, 8>}]} {
    %c0 = arith.constant 0 : index
    %c0_0 = arith.constant 0 : index
    %c0_1 = arith.constant 0 : index
    %0 = vector.load %arg1[%c0, %c0_0, %c0_1] : memref<1x8x32xf32, #tpu.memory_space<vmem>>, vector<1x8x32xf32>
    %1 = vector.shape_cast %0 : vector<1x8x32xf32> to vector<8x32xf32>
    %c0_2 = arith.constant 0 : index
    %c0_3 = arith.constant 0 : index
    %2 = vector.load %arg2[%c0_2, %c0_3] : memref<32x96xf32, #tpu.memory_space<vmem>>, vector<32x96xf32>
    %cst = arith.constant dense<0.000000e+00> : vector<8x96xf32>
    %3 = tpu.matmul %1, %2, %cst {dimension_numbers = #tpu.dot_dimension_numbers<[1], [0], [0], [1], [0, 0, 1, 1], [], []>} : vector<8x32xf32>, vector<32x96xf32>, vector<8x96xf32> -> vector<8x96xf32>
    %c0_4 = arith.constant 0 : index
    %c0_5 = arith.constant 0 : index
    %4 = vector.load %arg3[%c0_4, %c0_5] : memref<1x96xf32, #tpu.memory_space<vmem>>, vector<1x96xf32>
    %5 = vector.broadcast %4 : vector<1x96xf32> to vector<8x96xf32>
    %6 = arith.addf %3, %5 : vector<8x96xf32>
    %7 = vector.extract_strided_slice %6 {offsets = [0, 0], sizes = [8, 32], strides = [1, 1]} : vector<8x96xf32> to vector<8x32xf32>
    %cst_6 = arith.constant 0.353553385 : f32
    %8 = vector.broadcast %cst_6 : f32 to vector<8x32xf32>
    %9 = arith.mulf %7, %8 : vector<8x32xf32>
    %10 = vector.extract_strided_slice %6 {offsets = [0, 32], sizes = [8, 32], strides = [1, 1]} : vector<8x96xf32> to vector<8x32xf32>
    %11 = vector.extract_strided_slice %6 {offsets = [0, 64], sizes = [8, 32], strides = [1, 1]} : vector<8x96xf32> to vector<8x32xf32>
    %c0_7 = arith.constant 0 : index
    %c0_8 = arith.constant 0 : index
    %c0_9 = arith.constant 0 : index
    %12 = vector.load %arg4[%c0_7, %c0_8, %c0_9] : memref<1x8x8xf32, #tpu.memory_space<vmem>>, vector<1x8x8xf32>
    %13 = vector.shape_cast %12 : vector<1x8x8xf32> to vector<8x8xf32>
    %cst_10 = arith.constant 0.000000e+00 : f32
    %14 = vector.broadcast %cst_10 : f32 to vector<8x8xf32>
    %15 = vector.extract_strided_slice %9 {offsets = [0, 0], sizes = [8, 8], strides = [1, 1]} : vector<8x32xf32> to vector<8x8xf32>
    %16 = vector.extract_strided_slice %10 {offsets = [0, 0], sizes = [8, 8], strides = [1, 1]} : vector<8x32xf32> to vector<8x8xf32>
    %17 = vector.extract_strided_slice %11 {offsets = [0, 0], sizes = [8, 8], strides = [1, 1]} : vector<8x32xf32> to vector<8x8xf32>
    %cst_11 = arith.constant dense<0.000000e+00> : vector<8x8xf32>
    %18 = tpu.matmul %15, %16, %cst_11 {dimension_numbers = #tpu.dot_dimension_numbers<[1], [1], [0], [0], [0, 0, 1, 0], [], []>} : vector<8x8xf32>, vector<8x8xf32>, vector<8x8xf32> -> vector<8x8xf32>
    %19 = arith.addf %18, %13 : vector<8x8xf32>
    %cst_12 = arith.constant dense<0xFF800000> : vector<8xf32>
    %20 = vector.multi_reduction <maximumf>, %19, %cst_12 [1] : vector<8x8xf32> to vector<8xf32>
    %21 = vector.shape_cast %20 : vector<8xf32> to vector<8x1xf32>
    %22 = vector.broadcast %21 : vector<8x1xf32> to vector<8x8xf32>
    %23 = arith.subf %19, %22 : vector<8x8xf32>
    %24 = math.exp %23 : vector<8x8xf32>
    %cst_13 = arith.constant dense<0.000000e+00> : vector<8xf32>
    %25 = vector.multi_reduction <add>, %24, %cst_13 [1] : vector<8x8xf32> to vector<8xf32>
    %26 = vector.shape_cast %25 : vector<8xf32> to vector<8x1xf32>
    %27 = tpu.reciprocal %26 {approx = true} : vector<8x1xf32> -> vector<8x1xf32>
    %28 = vector.broadcast %27 : vector<8x1xf32> to vector<8x8xf32>
    %29 = arith.mulf %24, %28 : vector<8x8xf32>
    %30 = arith.addf %14, %29 : vector<8x8xf32>
    %cst_14 = arith.constant dense<0.000000e+00> : vector<8x8xf32>
    %31 = tpu.matmul %29, %17, %cst_14 {dimension_numbers = #tpu.dot_dimension_numbers<[1], [0], [0], [1], [0, 0, 1, 1], [], []>} : vector<8x8xf32>, vector<8x8xf32>, vector<8x8xf32> -> vector<8x8xf32>
    %32 = vector.extract_strided_slice %9 {offsets = [0, 8], sizes = [8, 8], strides = [1, 1]} : vector<8x32xf32> to vector<8x8xf32>
    %33 = vector.extract_strided_slice %10 {offsets = [0, 8], sizes = [8, 8], strides = [1, 1]} : vector<8x32xf32> to vector<8x8xf32>
    %34 = vector.extract_strided_slice %11 {offsets = [0, 8], sizes = [8, 8], strides = [1, 1]} : vector<8x32xf32> to vector<8x8xf32>
    %cst_15 = arith.constant dense<0.000000e+00> : vector<8x8xf32>
    %35 = tpu.matmul %32, %33, %cst_15 {dimension_numbers = #tpu.dot_dimension_numbers<[1], [1], [0], [0], [0, 0, 1, 0], [], []>} : vector<8x8xf32>, vector<8x8xf32>, vector<8x8xf32> -> vector<8x8xf32>
    %36 = arith.addf %35, %13 : vector<8x8xf32>
    %cst_16 = arith.constant dense<0xFF800000> : vector<8xf32>
    %37 = vector.multi_reduction <maximumf>, %36, %cst_16 [1] : vector<8x8xf32> to vector<8xf32>
    %38 = vector.shape_cast %37 : vector<8xf32> to vector<8x1xf32>
    %39 = vector.broadcast %38 : vector<8x1xf32> to vector<8x8xf32>
    %40 = arith.subf %36, %39 : vector<8x8xf32>
    %41 = math.exp %40 : vector<8x8xf32>
    %cst_17 = arith.constant dense<0.000000e+00> : vector<8xf32>
    %42 = vector.multi_reduction <add>, %41, %cst_17 [1] : vector<8x8xf32> to vector<8xf32>
    %43 = vector.shape_cast %42 : vector<8xf32> to vector<8x1xf32>
    %44 = tpu.reciprocal %43 {approx = true} : vector<8x1xf32> -> vector<8x1xf32>
    %45 = vector.broadcast %44 : vector<8x1xf32> to vector<8x8xf32>
    %46 = arith.mulf %41, %45 : vector<8x8xf32>
    %47 = arith.addf %30, %46 : vector<8x8xf32>
    %cst_18 = arith.constant dense<0.000000e+00> : vector<8x8xf32>
    %48 = tpu.matmul %46, %34, %cst_18 {dimension_numbers = #tpu.dot_dimension_numbers<[1], [0], [0], [1], [0, 0, 1, 1], [], []>} : vector<8x8xf32>, vector<8x8xf32>, vector<8x8xf32> -> vector<8x8xf32>
    %49 = vector.extract_strided_slice %9 {offsets = [0, 16], sizes = [8, 8], strides = [1, 1]} : vector<8x32xf32> to vector<8x8xf32>
    %50 = vector.extract_strided_slice %10 {offsets = [0, 16], sizes = [8, 8], strides = [1, 1]} : vector<8x32xf32> to vector<8x8xf32>
    %51 = vector.extract_strided_slice %11 {offsets = [0, 16], sizes = [8, 8], strides = [1, 1]} : vector<8x32xf32> to vector<8x8xf32>
    %cst_19 = arith.constant dense<0.000000e+00> : vector<8x8xf32>
    %52 = tpu.matmul %49, %50, %cst_19 {dimension_numbers = #tpu.dot_dimension_numbers<[1], [1], [0], [0], [0, 0, 1, 0], [], []>} : vector<8x8xf32>, vector<8x8xf32>, vector<8x8xf32> -> vector<8x8xf32>
    %53 = arith.addf %52, %13 : vector<8x8xf32>
    %cst_20 = arith.constant dense<0xFF800000> : vector<8xf32>
    %54 = vector.multi_reduction <maximumf>, %53, %cst_20 [1] : vector<8x8xf32> to vector<8xf32>
    %55 = vector.shape_cast %54 : vector<8xf32> to vector<8x1xf32>
    %56 = vector.broadcast %55 : vector<8x1xf32> to vector<8x8xf32>
    %57 = arith.subf %53, %56 : vector<8x8xf32>
    %58 = math.exp %57 : vector<8x8xf32>
    %cst_21 = arith.constant dense<0.000000e+00> : vector<8xf32>
    %59 = vector.multi_reduction <add>, %58, %cst_21 [1] : vector<8x8xf32> to vector<8xf32>
    %60 = vector.shape_cast %59 : vector<8xf32> to vector<8x1xf32>
    %61 = tpu.reciprocal %60 {approx = true} : vector<8x1xf32> -> vector<8x1xf32>
    %62 = vector.broadcast %61 : vector<8x1xf32> to vector<8x8xf32>
    %63 = arith.mulf %58, %62 : vector<8x8xf32>
    %64 = arith.addf %47, %63 : vector<8x8xf32>
    %cst_22 = arith.constant dense<0.000000e+00> : vector<8x8xf32>
    %65 = tpu.matmul %63, %51, %cst_22 {dimension_numbers = #tpu.dot_dimension_numbers<[1], [0], [0], [1], [0, 0, 1, 1], [], []>} : vector<8x8xf32>, vector<8x8xf32>, vector<8x8xf32> -> vector<8x8xf32>
    %66 = vector.extract_strided_slice %9 {offsets = [0, 24], sizes = [8, 8], strides = [1, 1]} : vector<8x32xf32> to vector<8x8xf32>
    %67 = vector.extract_strided_slice %10 {offsets = [0, 24], sizes = [8, 8], strides = [1, 1]} : vector<8x32xf32> to vector<8x8xf32>
    %68 = vector.extract_strided_slice %11 {offsets = [0, 24], sizes = [8, 8], strides = [1, 1]} : vector<8x32xf32> to vector<8x8xf32>
    %cst_23 = arith.constant dense<0.000000e+00> : vector<8x8xf32>
    %69 = tpu.matmul %66, %67, %cst_23 {dimension_numbers = #tpu.dot_dimension_numbers<[1], [1], [0], [0], [0, 0, 1, 0], [], []>} : vector<8x8xf32>, vector<8x8xf32>, vector<8x8xf32> -> vector<8x8xf32>
    %70 = arith.addf %69, %13 : vector<8x8xf32>
    %cst_24 = arith.constant dense<0xFF800000> : vector<8xf32>
    %71 = vector.multi_reduction <maximumf>, %70, %cst_24 [1] : vector<8x8xf32> to vector<8xf32>
    %72 = vector.shape_cast %71 : vector<8xf32> to vector<8x1xf32>
    %73 = vector.broadcast %72 : vector<8x1xf32> to vector<8x8xf32>
    %74 = arith.subf %70, %73 : vector<8x8xf32>
    %75 = math.exp %74 : vector<8x8xf32>
    %cst_25 = arith.constant dense<0.000000e+00> : vector<8xf32>
    %76 = vector.multi_reduction <add>, %75, %cst_25 [1] : vector<8x8xf32> to vector<8xf32>
    %77 = vector.shape_cast %76 : vector<8xf32> to vector<8x1xf32>
    %78 = tpu.reciprocal %77 {approx = true} : vector<8x1xf32> -> vector<8x1xf32>
    %79 = vector.broadcast %78 : vector<8x1xf32> to vector<8x8xf32>
    %80 = arith.mulf %75, %79 : vector<8x8xf32>
    %81 = arith.addf %64, %80 : vector<8x8xf32>
    %cst_26 = arith.constant dense<0.000000e+00> : vector<8x8xf32>
    %82 = tpu.matmul %80, %68, %cst_26 {dimension_numbers = #tpu.dot_dimension_numbers<[1], [0], [0], [1], [0, 0, 1, 1], [], []>} : vector<8x8xf32>, vector<8x8xf32>, vector<8x8xf32> -> vector<8x8xf32>
    %83 = tpu.concatenate %31, %48, %65, %82 in 1 : vector<8x8xf32>, vector<8x8xf32>, vector<8x8xf32>, vector<8x8xf32> -> vector<8x32xf32>
    %c0_27 = arith.constant 0 : index
    %c0_28 = arith.constant 0 : index
    %84 = vector.load %arg5[%c0_27, %c0_28] : memref<32x32xf32, #tpu.memory_space<vmem>>, vector<32x32xf32>
    %c0_29 = arith.constant 0 : index
    %c0_30 = arith.constant 0 : index
    %85 = vector.load %arg6[%c0_29, %c0_30] : memref<1x32xf32, #tpu.memory_space<vmem>>, vector<1x32xf32>
    %c0_31 = arith.constant 0 : index
    %c0_32 = arith.constant 0 : index
    %86 = vector.load %arg7[%c0_31, %c0_32] : memref<1x32xf32, #tpu.memory_space<vmem>>, vector<1x32xf32>
    %c0_33 = arith.constant 0 : index
    %c0_34 = arith.constant 0 : index
    %87 = vector.load %arg8[%c0_33, %c0_34] : memref<1x32xf32, #tpu.memory_space<vmem>>, vector<1x32xf32>
    %cst_35 = arith.constant dense<0.000000e+00> : vector<8x32xf32>
    %88 = tpu.matmul %83, %84, %cst_35 {dimension_numbers = #tpu.dot_dimension_numbers<[1], [0], [0], [1], [0, 0, 1, 1], [], []>} : vector<8x32xf32>, vector<32x32xf32>, vector<8x32xf32> -> vector<8x32xf32>
    %89 = vector.broadcast %85 : vector<1x32xf32> to vector<8x32xf32>
    %90 = arith.addf %88, %89 : vector<8x32xf32>
    %91 = arith.addf %90, %1 : vector<8x32xf32>
    %cst_36 = arith.constant dense<0.000000e+00> : vector<8xf32>
    %92 = vector.multi_reduction <add>, %91, %cst_36 [1] : vector<8x32xf32> to vector<8xf32>
    %93 = vector.shape_cast %92 : vector<8xf32> to vector<8x1xf32>
    %cst_37 = arith.constant 3.200000e+01 : f32
    %94 = vector.broadcast %cst_37 : f32 to vector<8x1xf32>
    %95 = arith.divf %93, %94 : vector<8x1xf32>
    %96 = vector.broadcast %95 : vector<8x1xf32> to vector<8x32xf32>
    %97 = arith.subf %91, %96 : vector<8x32xf32>
    %98 = arith.mulf %97, %97 : vector<8x32xf32>
    %cst_38 = arith.constant dense<0.000000e+00> : vector<8xf32>
    %99 = vector.multi_reduction <add>, %98, %cst_38 [1] : vector<8x32xf32> to vector<8xf32>
    %100 = vector.shape_cast %99 : vector<8xf32> to vector<8x1xf32>
    %cst_39 = arith.constant 3.200000e+01 : f32
    %101 = vector.broadcast %cst_39 : f32 to vector<8x1xf32>
    %102 = arith.divf %100, %101 : vector<8x1xf32>
    %103 = vector.broadcast %95 : vector<8x1xf32> to vector<8x32xf32>
    %104 = arith.subf %91, %103 : vector<8x32xf32>
    %cst_40 = arith.constant 9.99999974E-6 : f32
    %105 = vector.broadcast %cst_40 : f32 to vector<8x1xf32>
    %106 = arith.addf %102, %105 : vector<8x1xf32>
    %107 = math.rsqrt %106 : vector<8x1xf32>
    %108 = vector.broadcast %107 : vector<8x1xf32> to vector<8x32xf32>
    %109 = arith.mulf %104, %108 : vector<8x32xf32>
    %110 = vector.broadcast %86 : vector<1x32xf32> to vector<8x32xf32>
    %111 = arith.mulf %109, %110 : vector<8x32xf32>
    %112 = vector.broadcast %87 : vector<1x32xf32> to vector<8x32xf32>
    %113 = arith.addf %111, %112 : vector<8x32xf32>
    %c0_41 = arith.constant 0 : index
    %c0_42 = arith.constant 0 : index
    %c0_43 = arith.constant 0 : index
    %114 = vector.load %arg9[%c0_41, %c0_42, %c0_43] : memref<1x8x32xf32, #tpu.memory_space<vmem>>, vector<1x8x32xf32>
    %115 = vector.shape_cast %114 : vector<1x8x32xf32> to vector<8x32xf32>
    %116 = vector.shape_cast %113 : vector<8x32xf32> to vector<1x8x32xf32>
    tpu.vector_store %arg9[%c0_41, %c0_42, %c0_43], %116 {strides = array<i32>} : memref<1x8x32xf32, #tpu.memory_space<vmem>>, vector<1x8x32xf32>,
    %cst_44 = arith.constant 2.500000e-01 : f32
    %117 = vector.broadcast %cst_44 : f32 to vector<8x8xf32>
    %118 = arith.mulf %81, %117 : vector<8x8xf32>
    %c0_45 = arith.constant 0 : index
    %c0_46 = arith.constant 0 : index
    %c0_47 = arith.constant 0 : index
    %119 = vector.load %arg10[%c0_45, %c0_46, %c0_47] : memref<1x8x8xf32, #tpu.memory_space<vmem>>, vector<1x8x8xf32>
    %120 = vector.shape_cast %119 : vector<1x8x8xf32> to vector<8x8xf32>
    %121 = vector.shape_cast %118 : vector<8x8xf32> to vector<1x8x8xf32>
    tpu.vector_store %arg10[%c0_45, %c0_46, %c0_47], %121 {strides = array<i32>} : memref<1x8x8xf32, #tpu.memory_space<vmem>>, vector<1x8x8xf32>,
    return
  }
  func.func @transform_0(%arg0: i32) -> (i32, i32, i32) {
    %c0_i32 = arith.constant 0 : i32
    %c0_i32_0 = arith.constant 0 : i32
    %c0_i32_1 = arith.constant 0 : i32
    return %arg0, %c0_i32, %c0_i32_0 : i32, i32, i32
  }
  func.func @transform_1(%arg0: i32) -> (i32, i32) {
    %c0_i32 = arith.constant 0 : i32
    %c0_i32_0 = arith.constant 0 : i32
    %c0_i32_1 = arith.constant 0 : i32
    return %c0_i32, %c0_i32_0 : i32, i32
  }
  func.func @transform_2(%arg0: i32) -> (i32, i32) {
    %c0_i32 = arith.constant 0 : i32
    %c0_i32_0 = arith.constant 0 : i32
    %c0_i32_1 = arith.constant 0 : i32
    return %c0_i32, %c0_i32_0 : i32, i32
  }
  func.func @transform_3(%arg0: i32) -> (i32, i32, i32) {
    %c0_i32 = arith.constant 0 : i32
    %c0_i32_0 = arith.constant 0 : i32
    %c0_i32_1 = arith.constant 0 : i32
    return %arg0, %c0_i32, %c0_i32_0 : i32, i32, i32
  }
  func.func @transform_4(%arg0: i32) -> (i32, i32) {
    %c0_i32 = arith.constant 0 : i32
    %c0_i32_0 = arith.constant 0 : i32
    %c0_i32_1 = arith.constant 0 : i32
    return %c0_i32, %c0_i32_0 : i32, i32
  }
  func.func @transform_5(%arg0: i32) -> (i32, i32) {
    %c0_i32 = arith.constant 0 : i32
    %c0_i32_0 = arith.constant 0 : i32
    %c0_i32_1 = arith.constant 0 : i32
    return %c0_i32, %c0_i32_0 : i32, i32
  }
  func.func @transform_6(%arg0: i32) -> (i32, i32) {
    %c0_i32 = arith.constant 0 : i32
    %c0_i32_0 = arith.constant 0 : i32
    %c0_i32_1 = arith.constant 0 : i32
    return %c0_i32, %c0_i32_0 : i32, i32
  }
  func.func @transform_7(%arg0: i32) -> (i32, i32) {
    %c0_i32 = arith.constant 0 : i32
    %c0_i32_0 = arith.constant 0 : i32
    %c0_i32_1 = arith.constant 0 : i32
    return %c0_i32, %c0_i32_0 : i32, i32
  }
  func.func @transform_8(%arg0: i32) -> (i32, i32, i32) {
    %c0_i32 = arith.constant 0 : i32
    %c0_i32_0 = arith.constant 0 : i32
    %c0_i32_1 = arith.constant 0 : i32
    return %arg0, %c0_i32, %c0_i32_0 : i32, i32, i32
  }
  func.func @transform_9(%arg0: i32) -> (i32, i32, i32) {
    %c0_i32 = arith.constant 0 : i32
    %c0_i32_0 = arith.constant 0 : i32
    %c0_i32_1 = arith.constant 0 : i32
    return %arg0, %c0_i32, %c0_i32_0 : i32, i32, i32
  }
}

</mosaic_0001>

<bundles_post_ra>
// kernel: tpu_custom_call.1
= control target key start
LH: loop header
LB: loop body
LE: loop exit
PB: predicated region body
PF: predicated region fallthrough
CT: control target
= control target key end

     0   :  { %s2447_s0 = inlined_call_operand.hbm [shape: f32[2,8,32], index: 0, kind: input, shape index: {}]   ;;  %s2448_s1 = inlined_call_operand.hbm [shape: f32[32,96], index: 1, kind: input, shape index: {}]   ;;  %s2449_s2 = inlined_call_operand.vmem [shape: f32[1,96], index: 2, kind: input, shape index: {}]   ;;  %s2450_s3 = inlined_call_operand.hbm [shape: f32[2,8,8], index: 3, kind: input, shape index: {}]   ;;  %s2451_s4 = inlined_call_operand.hbm [shape: f32[32,32], index: 4, kind: input, shape index: {}]   ;;  %s2452_s5 = inlined_call_operand.vmem [shape: f32[1,32], index: 5, kind: input, shape index: {}]   ;;  %s2453_s6 = inlined_call_operand.vmem [shape: f32[1,32], index: 6, kind: input, shape index: {}]   ;;  %s2454_s7 = inlined_call_operand.vmem [shape: f32[1,32], index: 7, kind: input, shape index: {}]   ;;  %s2455_s8 = inlined_call_operand.hbm [shape: f32[2,8,32], index: 8, kind: output, shape index: {0}]   ;;  %s2456_s9 = inlined_call_operand.hbm [shape: f32[2,8,8], index: 9, kind: output, shape index: {1}]  }
   0x1   :  { %2472 = sst [smem:[#allocation23_spill]] %s2448_s1 }
   0x2   :  { %15 = vsyncpa [#allocation3], 0 }
   0x3   :  { %17 = vsyncpa [#allocation3 + $0x1], 0 }
   0x4   :  { %18 = vsyncpa [#allocation6], 0 }
   0x5   :  { %19 = vsyncpa [#allocation4], 0 }
   0x6   :  { %21 = vsyncpa [#allocation4 + $0x1], 0 }
   0x7   :  { %22 = vsyncpa [#allocation11], 0 }
   0x8   :  { %24 = vsyncpa [#allocation11 + $0x1], 0  ;;  %s2040_s30 = smov 0   ;;  %s2042_s10 = smov 0  }
   0x9   :  { %s2044_s11 = smov 0   ;;  %s2046_s12 = smov 0  }
   0xa LB: > { %2473 = sst [smem:[#allocation18_spill]] %s1959_s11  ;;  %s2061_s13 = sadd.s32 4294967295, %s1963_s12   ;;  %s1963_s12 = sphi %s2046_s12, %s2504_s12   ;;  %s1959_s11 = sphi %s2044_s11, %s2506_s11   ;;  %s1955_s10 = sphi %s2042_s10, %s2508_s10   ;;  %s1951_s30 = sphi %s2040_s30, %s2507_s30  }
   0xb   : > { %2474 = sst [smem:[#allocation19_spill]] %s1963_s12  ;;  %s1483_s14 = sadd.s32 4294967294, %s1963_s12  }
   0xc   : > { %p50_p0 = scmp.ne.s32.totalorder %s1955_s10, %s1951_s30  ;;  %p2457_p1 = scmp.eq.s32.totalorder %s2061_s13, 0 }
   0xd   : > { %p232_p3 = scmp.eq.s32.totalorder %s1483_s14, 1  ;;  %p1484_p5 = scmp.ge.s32.totalorder %s1963_s12, 1 }
   0xe   : > { %p2070_p4 = por %p2457_p1, %p50_p0  ;;  %p265_p7 = scmp.lt.s32.totalorder %s1963_s12, 3 }
   0xf   : > { %p2075_p6 = por %p232_p3, %p50_p0  ;;  %s1965_s18 = smov [#allocation5]  }
  0x10   : > { %s2475_s15 = scalar_select %p2070_p4, 1, 0 }
  0x11   : > { %s2476_s16 = scalar_select %p2075_p6, 1, 0 }
  0x12   : > { %p2080_p8 = pnand %p1484_p5, %p265_p7  ;;  %s277_s19 = sshll.u32 %s1965_s18, 4  ;;  %s2084_s19 = int_to_ptr.vmem [resolvable:$true] %s277_s19 }
  0x13   : > { %2477 = sst [smem:[#allocation20_spill]] %s2476_s16  ;;  %s2096_s21 = sadd.s32 1, %s1963_s12  }
  0x14   : > { %s2478_s17 = scalar_select %p2080_p8, 1, 0 }
  0x15   : > { %p1639_p9 = pneg %p2080_p8  ;;  %2480 = sst [smem:[#allocation21_spill]] %s2096_s21 }
  0x16   : > { %s37_s22 = sadd.s32 1, %s1959_s11  ;;  %s34_s23 = ssub.s32 %s1963_s12, %s2096_s21 }
  0x17   : > { %p2091_p11 = pnand %p1639_p9, %p2457_p1  ;;  %s2481_s1 = sld [smem:[#allocation23_spill]] }
  0x19   : > { %p2465_p13 = pneg %p2091_p11 }
  0x1d   : > { %s1737_s26 = scalar_lea.hbm %s2481_s1, 512 }
  0x1e   : > { %p1738_p12 = scmp.ne.s32.totalorder %s2481_s1, %s1737_s26  ;;  %p1744_p5 = scmp.lt.u32.totalorder %s1737_s26, %s2481_s1 }
  0x20   : > { %p1740_p0 = pnand %p2465_p13, %p1738_p12 }
  0x22   : > { %p1741_p3 = pneg %p1740_p0 }
  0x24   : > { %p1746_p7 = pnand %p1744_p5, %p1741_p3 }
  0x26   : > { %1749 = shalt.err (!%p1746_p7)
}
  0x27   : > { %s1750_s18 = scalar_lea.vmem %s2084_s19, 512  ;;  %p1758_p2 = scmp.lt.s32.totalorder %s2084_s19, %s2084_s19 }
  0x28   : > { %p1751_p9 = scmp.ne.s32.totalorder %s2084_s19, %s1750_s18  ;;  %p1759_p12 = scmp.lt.s32.totalorder %s1750_s18, %s1750_s18 }
  0x2a   : > { %p1753_p10 = pnand %p1751_p9, %p2465_p13  ;;  %p1760_p0 = por %p1759_p12, %p1758_p2 }
  0x2c   : > { %p1754_p1 = pneg %p1753_p10 }
  0x2e   : > { %p1761_p6 = pnand %p1760_p0, %p1754_p1 }
  0x30   : > { %1764 = shalt.err (!%p1761_p6)
}
  0x31   : > { %s2461_s24 = smov 128   ;;  %s2462_s25 = smov 8  }
  0x32   : > { %1642 = dma.hbm_to_vmem [thread:$0]  (!%p2091_p11), %s2481_s1, 512, %s2084_s19, [#allocation6], %s2461_s24, %s2461_s24, %s2462_s25  }
  0x33   : > { %p35_p1 = scmp.eq.s32.totalorder %s34_s23, 0  ;;  %p44_p2 = scmp.ne.s32.totalorder %s1959_s11, %s1955_s10 }
  0x34   : > { %p45_p6 = scmp.eq.s32.totalorder %s1963_s12, 0  ;;  %p1662_p10 = scmp.lt.s32.totalorder %s1963_s12, 2 }
  0x35   : > { %s2136_s28 = scalar_select %p35_p1, %s1959_s11, %s37_s22  }
  0x36   : > { %p46_p3 = por %p45_p6, %p44_p2  ;;  %p2483_p5 = scmp.eq.s32.totalorder %s2061_s13, 1 }
  0x37   : > { %2482 = sst [smem:[#allocation22_spill]] %s2136_s28  ;;  %s316_s14 = sand.u32 1, %s1963_s12  }
  0x38   : > { %p2140_p7 = por %p2483_p5, %p44_p2  ;;  %s318_s18 = sand.u32 1, %s1959_s11  }
  0x39   : > { %s2146_s21 = sshll.u32 %s318_s18, 3  ;;  %s1489_s16 = sshll.u32 %s1963_s12, 7 }
  0x3a   : > { %s2484_s29 = scalar_select %p2140_p7, 1, 0 }
  0x3b   : > { %s2152_s23 = scalar_lea.hbm %s2447_s0, %s1489_s16  ;;  %s320_s22 = scalar_lea.vmem [#allocation2], %s2146_s21 }
  0x3c   : > { %s327_s27 = sshll.u32 %s320_s22, 4  ;;  %p2157_p9 = pnand %p1662_p10, %p46_p3  ;;  %s2155_s27 = int_to_ptr.vmem [resolvable:$true] %s327_s27 }
  0x3d   : > { %s2164_s26 = scalar_lea.hbm %s2450_s3, %s1489_s16  ;;  %s2166_s19 = scalar_lea.sflag [#allocation3], %s316_s14 }
  0x3e   : > { %s2485_s24 = scalar_select %p2157_p9, 1, 0 }
  0x3f   : > { %s1765_s1 = scalar_lea.hbm %s2152_s23, 128  ;;  %p2469_p0 = pneg %p2157_p9 }
  0x40   : > { %p1766_p12 = scmp.ne.s32.totalorder %s2152_s23, %s1765_s1  ;;  %s1770_s11 = scalar_lea.hbm %s2447_s0, 256 }
  0x41   : > { %p1771_p6 = scmp.lt.u32.totalorder %s2152_s23, %s2447_s0  ;;  %p1772_p10 = scmp.lt.u32.totalorder %s1770_s11, %s1765_s1 }
  0x42   : > { %p1768_p1 = pnand %p2469_p0, %p1766_p12  ;;  %p1774_p5 = scmp.lt.u32.totalorder %s1765_s1, %s2152_s23 }
  0x43   : > { %p1773_p3 = por %p1772_p10, %p1771_p6 }
  0x44   : > { %p1769_p2 = pneg %p1768_p1 }
  0x45   : > { %p1775_p13 = por %p1774_p5, %p1773_p3 }
  0x47   : > { %p1776_p7 = pnand %p1775_p13, %p1769_p2 }
  0x49   : > { %1779 = shalt.err (!%p1776_p7)
}
  0x4a   : > { %s1780_s16 = scalar_lea.vmem %s2155_s27, 128  ;;  %s1968_s28 = smov [#allocation2]  }
  0x4b   : > { %p1781_p12 = scmp.ne.s32.totalorder %s2155_s27, %s1780_s16  ;;  %s1785_s14 = sshll.u32 %s1968_s28, 4  ;;  %s1786_s14 = int_to_ptr.vmem [resolvable:$false] %s1785_s14 }
  0x4c   : > { %s1787_s12 = scalar_lea.vmem %s1786_s14, 256  ;;  %p1788_p8 = scmp.lt.s32.totalorder %s2155_s27, %s1786_s14 }
  0x4d   : > { %p1783_p1 = pnand %p1781_p12, %p2469_p0  ;;  %p1789_p6 = scmp.lt.s32.totalorder %s1787_s12, %s1780_s16 }
  0x4f   : > { %p1784_p4 = pneg %p1783_p1  ;;  %p1790_p10 = por %p1789_p6, %p1788_p8 }
  0x51   : > { %p1791_p3 = pnand %p1790_p10, %p1784_p4 }
  0x53   : > { %1794 = shalt.err (!%p1791_p3)
}
  0x54   : > { %1649 = dma.hbm_to_vmem [thread:$0]  (!%p2157_p9), %s2152_s23, 128, %s2155_s27, %s2166_s19  }
  0x55   : > { %s1969_s1 = smov [#allocation8]   ;;  %s338_s18 = scalar_lea.vmem [#allocation7], %s2146_s21 }
  0x56   : > { %s293_s11 = sshll.u32 %s1969_s1, 4  ;;  %s345_s22 = sshll.u32 %s338_s18, 4  ;;  %s294_s11 = int_to_ptr.vmem [resolvable:$true] %s293_s11  ;;  %s2195_s22 = int_to_ptr.vmem [resolvable:$true] %s345_s22 }
  0x57   : > { %s1795_s28 = scalar_lea.hbm %s2451_s4, 512  ;;  %p2486_p8 = pneg %p2091_p11 }
  0x58   : > { %p1796_p4 = scmp.ne.s32.totalorder %s2451_s4, %s1795_s28  ;;  %p1802_p2 = scmp.lt.u32.totalorder %s1795_s28, %s2451_s4 }
  0x5a   : > { %p1798_p13 = pnand %p1796_p4, %p2486_p8 }
  0x5c   : > { %p1799_p7 = pneg %p1798_p13 }
  0x5e   : > { %p1804_p5 = pnand %p1802_p2, %p1799_p7 }
  0x60   : > { %1807 = shalt.err (!%p1804_p5)
}
  0x61   : > { %s1808_s21 = scalar_lea.vmem %s294_s11, 512  ;;  %p2487_p1 = pmov %p2486_p8 }
  0x62   : > { %p1809_p12 = scmp.ne.s32.totalorder %s294_s11, %s1808_s21  ;;  %p1816_p3 = scmp.lt.s32.totalorder %s294_s11, %s294_s11 }
  0x63   : > { %p1817_p0 = scmp.lt.s32.totalorder %s1808_s21, %s1808_s21 }
  0x64   : > { %p1811_p6 = pnand %p1809_p12, %p2487_p1 }
  0x65   : > { %p1818_p9 = por %p1817_p0, %p1816_p3 }
  0x66   : > { %p1812_p10 = pneg %p1811_p6 }
  0x68   : > { %p1819_p4 = pnand %p1818_p9, %p1812_p10 }
  0x6a   : > { %1822 = shalt.err (!%p1819_p4)
}
  0x6b   : > { %s2488_s1 = smov 8   ;;  %s2489_s18 = smov 128  }
  0x6c   : > { %1645 = dma.hbm_to_vmem [thread:$0]  (!%p2091_p11), %s2451_s4, 512, %s294_s11, [#allocation6], %s2489_s18, %s2489_s18, %s2488_s1  }
  0x6d   : > { %s1823_s28 = scalar_lea.hbm %s2164_s26, 128  ;;  %p2490_p13 = scmp.ne.s32.totalorder %s2485_s24, 0 }
  0x6e   : > { %p1824_p8 = scmp.ne.s32.totalorder %s2164_s26, %s1823_s28  ;;  %s1828_s12 = scalar_lea.hbm %s2450_s3, 256 }
  0x6f   : > { %p2491_p0 = pneg %p2490_p13  ;;  %p1829_p2 = scmp.lt.u32.totalorder %s2164_s26, %s2450_s3 }
  0x70   : > { %p1830_p5 = scmp.lt.u32.totalorder %s1828_s12, %s1823_s28  ;;  %p1832_p1 = scmp.lt.u32.totalorder %s1823_s28, %s2164_s26 }
  0x71   : > { %p1826_p9 = pnand %p1824_p8, %p2491_p0 }
  0x72   : > { %p1831_p12 = por %p1830_p5, %p1829_p2 }
  0x73   : > { %p1827_p7 = pneg %p1826_p9 }
  0x74   : > { %p1833_p6 = por %p1832_p1, %p1831_p12 }
  0x76   : > { %p1834_p10 = pnand %p1833_p6, %p1827_p7 }
  0x78   : > { %1837 = shalt.err (!%p1834_p10)
}
  0x79   : > { %s1838_s11 = scalar_lea.vmem %s2195_s22, 128  ;;  %p2492_p3 = pmov %p2491_p0 }
  0x7a   : > { %p1839_p11 = scmp.ne.s32.totalorder %s2195_s22, %s1838_s11  ;;  %s1970_s21 = smov [#allocation7]  }
  0x7b   : > { %s1843_s1 = sshll.u32 %s1970_s21, 4  ;;  %s1844_s1 = int_to_ptr.vmem [resolvable:$false] %s1843_s1 }
  0x7c   : > { %p1841_p4 = pnand %p1839_p11, %p2492_p3  ;;  %s1845_s18 = scalar_lea.vmem %s1844_s1, 256 }
  0x7d   : > { %p1846_p0 = scmp.lt.s32.totalorder %s2195_s22, %s1844_s1  ;;  %p1847_p9 = scmp.lt.s32.totalorder %s1845_s18, %s1838_s11 }
  0x7e   : > { %p1842_p8 = pneg %p1841_p4 }
  0x7f   : > { %p1848_p2 = por %p1847_p9, %p1846_p0 }
  0x81   : > { %p1849_p5 = pnand %p1848_p2, %p1842_p8 }
  0x83   : > { %1852 = shalt.err (!%p1849_p5)
}
  0x84   : > { %1652 = dma.hbm_to_vmem [thread:$0]  (!%p2490_p13), %s2164_s26, 128, %s2195_s22, %s2166_s19  }
  0x85   : > { %p2493_p7 = scmp.ne.s32.totalorder %s2478_s17, 0 }
  0x86   : > { %s356_s25 = sand.u32 (!%p2493_p7), 1, %s2061_s13   ;;  %s2248_s16 = sand.u32 (!%p2493_p7), 1, %s1955_s10  }
  0x87   : > { %354 = sbr.rel (%p2493_p7) target bundleno = 2474 (0x9aa), region = 52  ;;  %s2251_s28 = sshll.u32 (!%p2493_p7), %s2248_s16, 3 }
  0x88   : > { %s357_s14 = scalar_lea.sflag (!%p2493_p7), [#allocation3], %s356_s25  ;;  %s360_s20 = scalar_lea.vmem (!%p2493_p7), [#allocation2], %s2251_s28 }
  0x89   : > { %p2494_p12 = scmp.ne.s32.totalorder (!%p2493_p7), %s2475_s15, 0 }
  0x8e   : > { %1926 = dma.done.wait (%p2494_p12), %s357_s14, 128  }
  0x8f   : > { %1928 = vsyncadd (%p2494_p12), %s357_s14, 4294967168  ;;  %p2495_p13 = scmp.eq.s32.totalorder %s2061_s13, 0 }
  0x91   : > { %1930 = dma.done.wait (%p2495_p13), [#allocation6], 512   ;;  %p2496_p1 = pmov %p2495_p13 }
  0x92   : > { %s373_s17 = scalar_lea.vmem [#allocation7], %s2251_s28 }
  0x93   : > { %1932 = vsyncadd (%p2496_p1), [#allocation6], 4294966784 }
  0x94   : > { %1934 = dma.done.wait (%p2494_p12), %s357_s14, 128  }
  0x95   : > { %1936 = vsyncadd (%p2494_p12), %s357_s14, 4294967168  ;;  %p2497_p6 = pmov %p2496_p1 }
  0x96   : > { %p2498_p10 = pmov %p2496_p1 }
  0x97   : > { %1938 = dma.done.wait (%p2497_p6), [#allocation6], 512  }
  0x98   : > { %1940 = vsyncadd (%p2498_p10), [#allocation6], 4294966784  ;;  %v1971_v0 = vmov 0.0|0.0   ;;  %vm1972_vm0 = vmmov 0   ;;  %v1973_v1 = vmov 0.0   ;;  %v423_v2 = vld [vmem:[#allocation5] sm:$0xff] }
  0x99   : > { %1611 = vmatprep.subr.bf16.mxu0 %v1971_v0  ;;  %1557 = vmatprep.mubr.msk.f32.mxu0 %vm1972_vm0, %v1973_v1  ;;  %v424_v3 = vld [vmem:[#allocation5 + $0x8] sm:$0xff]  ;;  %v425_v4 = vld [vmem:[#allocation5 + $0x10] sm:$0xff]  ;;  %v426_v6 = vld [vmem:[#allocation5 + $0x18] sm:$0xff]  ;;  %vm434_vm1 = vcmask 261120   ;;  %s1974_s26 = smov 64   ;;  %s1975_s19 = smov 96  }
  0x9a   : > { %1560 = vmatprep.subr.mxu1 %v1973_v1  ;;  %1562 = vmatprep.mubr.msk.f32.mxu1 %vm1972_vm0, %v1973_v1  ;;  %v1612_v5 = vpack.c.bf16 %v424_v3, %v423_v2  ;;  %v1615_v7 = vpack.c.bf16 %v426_v6, %v425_v4  ;;  %v2278_v8 = vld [vmem:[%s360_s20] sm:$0xff]  ;;  %s1976_s22 = smov 88   ;;  %s1977_s12 = smov 120   ;;  %vm513_vm2 = vcmask 64512   ;;  %v509_v19 = vld [vmem:[%s373_s17] sm:$0xff]  ;;  %vm1188_vm3 = vcmask 130048  }
  0x9b   : > { %v1499_v9 = vld [vmem:[%s2449_s2] ss:$0 sm:$0xff]  ;;  %s1978_s23 = smov 80   ;;  %s1979_s27 = smov 72   ;;  %vm1190_vm4 = vcmask 195584  }
  0x9c   : > { %1613 = vmatpush3.bf16.msra.mxu0 %v1612_v5  ;;  %s1980_s11 = smov 112   ;;  %s1981_s21 = smov 104  }
  0x9d   : > { %1614 = vmatprep.subr.bf16.mxu0 %v1971_v0  ;;  %s1982_s1 = smov 56   ;;  %s1983_s18 = smov 48  }
  0x9e   : > { %s1984_s25 = smov 40   ;;  %s421_s14 = scalar_lea.vmem [#allocation10], %s2251_s28 }
  0x9f   : > { %s1985_s20 = smov 8   ;;  %s1986_s17 = smov 16  }
  0xa0   : > { %1616 = vmatpush3.bf16.msra.mxu0 %v1615_v7  ;;  %s1987_s15 = smov 24   ;;  %p2499_p3 = scmp.ne.s32.totalorder %s2484_s29, 0 }
  0xa1   : > { %1580 = vmatprep.subr.mxu0 %v1973_v1 }
  0xa3   : > { %1558 = vmatmul.mubr.msk.f32.vlgmr.msra.gmra.mrb[0].mxu0 %vm434_vm1, %v2278_v8 }
  0xa4   : > { %1582 = vmatprep.mubr.msk.f32.mxu0 %vm1972_vm0, %v1973_v1 }
 0x176   : > { %v504_v10 = vpop.f32.mrb[0].mxu0 }
 0x177   : > { %v2288_v11 = vadd.f32 %v1499_v9, %v504_v10  ;;  %v1559_v12 = vpop.f32.mrb[1].mxu0 }
 0x179   : > { %601 = vrot.lane.b32.xlu1 %v2288_v11, %s1974_s26  ;;  %511 = vrot.lane.b32.xlu0 %v2288_v11, %s1975_s19  ;;  %v508_v13 = vmul.f32 0.35355338, %v2288_v11  ;;  %s1519_s19 = sshll.u32 %s2061_s13, 7 }
 0x17d   : > { %679 = vrot.lane.b32.xlu1 %v2288_v11, %s1976_s22 }
 0x181   : > { %677 = vrot.lane.b32.xlu1 %v508_v13, %s1977_s12 }
 0x185   : > { %845 = vrot.lane.b32.xlu1 %v2288_v11, %s1978_s23  ;;  %s2368_s23 = scalar_lea.hbm %s2456_s9, %s1519_s19 }
 0x1eb   : > { %v602_v14 = vpop.permute.xlu1 %601  ;;  %v512_v15 = vpop.permute.xlu0 %511 }
 0x1ec   : > { %1561 = vmatpush3.xpose.msk.msra.mxu1 %vm513_vm2, %v512_v15 }
 0x1ed   : > { %1565 = vmatprep.subr.mxu1 %v1973_v1 }
 0x1ef   : > { %v680_v16 = vpop.permute.xlu1 %679  ;;  %1563 = vmatmul.mubr.msk.f32.vlgmr.msra.gmra.mrb[0].mxu1 %vm513_vm2, %v508_v13 }
 0x1f0   : > { %1566 = vmatpush3.msra.mxu1 %v602_v14  ;;  %1567 = vmatprep.mubr.msk.f32.mxu1 %vm1972_vm0, %v1973_v1 }
 0x1f1   : > { %1570 = vmatprep.subr.mxu1 %v1973_v1 }
 0x1f3   : > { %v678_v17 = vpop.permute.xlu1 %677 }
 0x1f7   : > { %v846_v18 = vpop.permute.xlu1 %845 }
 0x1f8   : > { %1581 = vmatpush3.xpose.msk.msra.mxu0 %vm513_vm2, %v846_v18 }
 0x1f9   : > { %1590 = vmatprep.subr.mxu0 %v1973_v1 }
 0x2c2   : > { %v585_v20 = vpop.f32.mrb[0].mxu1 }
 0x2c3   : > { %v586_v21 = vadd.f32 %v585_v20, %v509_v19  ;;  %v1564_v22 = vpop.f32.mrb[1].mxu1  ;;  %v1193_v20 = vld [vmem:[#allocation8 + $0x8] sm:$0xff] }
 0x2c4   : > { %v1194_v22 = vld [vmem:[#allocation8 + $0x10] sm:$0xff] }
 0x2c5   : > { %v589_v23 = vsel %vm513_vm2, %v586_v21, -inf }
 0x2c6   : > { %590 = vmax.xlane.f32.xlu0 %v589_v23  ;;  %v1195_v23 = vld [vmem:[#allocation8 + $0x18] sm:$0xff] }
 0x2dc   : > { %1011 = vrot.lane.b32.xlu0 %v2288_v11, %s1979_s27  ;;  %s1342_s27 = sshll.u32 %s421_s14, 4  ;;  %s1343_s27 = int_to_ptr.vmem [resolvable:$true] %s1342_s27 }
 0x353   : > { %v591_v24 = vpop.xlane.xlu0 %590 }
 0x354   : > { %v592_v25 = vsub.f32 %v586_v21, %v591_v24  ;;  %v1621_v24 = vpack.c.bf16 %v1195_v23, %v1194_v22 }
 0x356   : > { %v593_v26 = vmul.f32 1.442695, %v592_v25 }
 0x357   : > { %v1012_v31 = vpop.permute.xlu0 %1011 }
 0x358   : > { %1719 = vpow2.f32 %v593_v26 }
 0x362   : > { %v1720_v27 = vpop.eup %1719 }
 0x363   : > { %v595_v28 = vsel %vm513_vm2, %v1720_v27, 0.0 }
 0x364   : > { %596 = vadd.xlane.f32.xlu1 %v595_v28 }
 0x375   : > { %843 = vrot.lane.b32.xlu1 %v508_v13, %s1980_s11  ;;  %s1316_s11 = scalar_lea.sflag [#allocation11], %s2248_s16 }
 0x379   : > { %1009 = vrot.lane.b32.xlu1 %v508_v13, %s1981_s21  ;;  %s1853_s21 = scalar_lea.vmem %s1343_s27, 128 }
 0x37a   : > { %p1854_p11 = scmp.ne.s32.totalorder %s1343_s27, %s1853_s21 }
 0x37c   : > { %p1855_p4 = pnand %p1854_p11, %p2499_p3 }
 0x37e   : > { %p1856_p8 = pneg %p1855_p4 }
 0x3f1   : > { %v597_v29 = vpop.xlane.xlu1 %596 }
 0x3f2   : > { %1721 = vrcp.f32 %v597_v29 }
 0x3f5   : > { %v844_v30 = vpop.permute.xlu1 %843 }
 0x3f6   : > { %1583 = vmatmul.mubr.msk.f32.vlgmr.msra.gmra.mrb[2].mxu0 %vm513_vm2, %v844_v30 }
 0x3f7   : > { %1591 = vmatpush3.xpose.msk.msra.mxu0 %vm513_vm2, %v1012_v31  ;;  %1592 = vmatprep.mubr.msk.f32.mxu0 %vm1972_vm0, %v1973_v1 }
 0x3f8   : > { %1617 = vmatprep.subr.bf16.mxu0 %v1971_v0 }
 0x3f9   : > { %v1010_v32 = vpop.permute.xlu1 %1009 }
 0x3fa   : > { %1593 = vmatmul.mubr.msk.f32.vlgmr.msra.gmra.mrb[4].mxu0 %vm513_vm2, %v1010_v32 }
 0x3fb   : > { %1608 = vmatprep.mubr.msk.f32.mxu0 %vm1972_vm0, %v1973_v1 }
 0x3fc   : > { %v1722_v33 = vpop.eup %1721 }
 0x3fd   : > { %v2316_v34 = vmul.f32 %v1722_v33, %v1720_v27 }
 0x3ff   : > { %1568 = vmatmul.mubr.msk.f32.vlgmr.msra.gmra.mrb[2].mxu1 %vm513_vm2, %v2316_v34 }
 0x400   : > { %1571 = vmatpush3.xpose.msk.msra.mxu1 %vm513_vm2, %v680_v16  ;;  %1572 = vmatprep.mubr.msk.f32.mxu1 %vm1972_vm0, %v1973_v1 }
 0x401   : > { %1575 = vmatprep.subr.mxu1 %v1973_v1 }
 0x403   : > { %1573 = vmatmul.mubr.msk.f32.vlgmr.msra.gmra.mrb[4].mxu1 %vm513_vm2, %v678_v17 }
 0x404   : > { %1577 = vmatprep.mubr.msk.f32.mxu1 %vm1972_vm0, %v1973_v1 }
 0x4c9   : > { %v917_v35 = vpop.f32.mrb[2].mxu0 }
 0x4ca   : > { %v918_v36 = vadd.f32 %v917_v35, %v509_v19  ;;  %v1584_v37 = vpop.f32.mrb[3].mxu0  ;;  %v1513_v35 = vld [vmem:[%s2452_s5] ss:$0 sm:$0xff] }
 0x4cc   : > { %v921_v38 = vsel %vm513_vm2, %v918_v36, -inf }
 0x4cd   : > { %922 = vmax.xlane.f32.xlu0 %v921_v38  ;;  %v1083_v39 = vpop.f32.mrb[4].mxu0 }
 0x4ce   : > { %v1594_v40 = vpop.f32.mrb[5].mxu0  ;;  %v1084_v46 = vadd.f32 %v1083_v39, %v509_v19 }
 0x4d0   : > { %v1087_v48 = vsel %vm513_vm2, %v1084_v46, -inf }
 0x4d2   : > { %v2328_v41 = vpop.f32.mrb[2].mxu1 }
 0x4d3   : > { %v1569_v42 = vpop.f32.mrb[3].mxu1 }
 0x4d6   : > { %v751_v43 = vpop.f32.mrb[4].mxu1 }
 0x4d7   : > { %v752_v44 = vadd.f32 %v751_v43, %v509_v19  ;;  %v1574_v45 = vpop.f32.mrb[5].mxu1  ;;  %v1192_v19 = vld [vmem:[#allocation8] sm:$0xff] }
 0x4d8   : > { %v1618_v21 = vpack.c.bf16 %v1193_v20, %v1192_v19 }
 0x4d9   : > { %v755_v47 = vsel %vm513_vm2, %v752_v44, -inf }
 0x4da   : > { %756 = vmax.xlane.f32.xlu1 %v755_v47  ;;  %1619 = vmatpush3.bf16.msra.mxu0 %v1618_v21 }
 0x4db   : > { %1620 = vmatprep.subr.bf16.mxu0 %v1971_v0 }
 0x4de   : > { %1088 = vmax.xlane.f32.xlu1 %v1087_v48  ;;  %1622 = vmatpush3.bf16.msra.mxu0 %v1621_v24 }
 0x55a   : > { %v923_v49 = vpop.xlane.xlu0 %922 }
 0x55b   : > { %v924_v50 = vsub.f32 %v918_v36, %v923_v49 }
 0x55d   : > { %v925_v51 = vmul.f32 1.442695, %v924_v50 }
 0x55f   : > { %1723 = vpow2.f32 %v925_v51 }
 0x567   : > { %v757_v52 = vpop.xlane.xlu1 %756 }
 0x568   : > { %v758_v60 = vsub.f32 %v752_v44, %v757_v52 }
 0x569   : > { %v1724_v53 = vpop.eup %1723 }
 0x56a   : > { %v927_v54 = vsel %vm513_vm2, %v1724_v53, 0.0  ;;  %v759_v61 = vmul.f32 1.442695, %v758_v60 }
 0x56b   : > { %928 = vadd.xlane.f32.xlu1 %v927_v54  ;;  %v1089_v55 = vpop.xlane.xlu1 %1088 }
 0x56c   : > { %v1090_v56 = vsub.f32 %v1084_v46, %v1089_v55 }
 0x56e   : > { %v1091_v57 = vmul.f32 1.442695, %v1090_v56 }
 0x570   : > { %1725 = vpow2.f32 %v1091_v57 }
 0x571   : > { %1727 = vpow2.f32 %v759_v61 }
 0x57a   : > { %v1726_v58 = vpop.eup %1725 }
 0x57b   : > { %v1093_v59 = vsel %vm513_vm2, %v1726_v58, 0.0  ;;  %v1728_v62 = vpop.eup %1727 }
 0x57c   : > { %767 = vrot.lane.b32.xlu1 %v2288_v11, %s1982_s1  ;;  %1094 = vadd.xlane.f32.xlu0 %v1093_v59  ;;  %v761_v63 = vsel %vm513_vm2, %v1728_v62, 0.0  ;;  %s1988_s1 = smov [#allocation10]  }
 0x592   : > { %933 = vrot.lane.b32.xlu0 %v2288_v11, %s1983_s18  ;;  %s1857_s18 = sshll.u32 %s1988_s1, 4  ;;  %s1858_s18 = int_to_ptr.vmem [resolvable:$false] %s1857_s18 }
 0x593   : > { %p1860_p0 = scmp.lt.s32.totalorder %s1343_s27, %s1858_s18 }
 0x5a0   : > { %762 = vadd.xlane.f32.xlu1 %v761_v63 }
 0x5b1   : > { %1099 = vrot.lane.b32.xlu1 %v2288_v11, %s1984_s25  ;;  %s1859_s25 = scalar_lea.vmem %s1858_s18, 256 }
 0x5b2   : > { %p1861_p9 = scmp.lt.s32.totalorder %s1859_s25, %s1853_s21 }
 0x5b4   : > { %p1862_p2 = por %p1861_p9, %p1860_p0 }
 0x5b6   : > { %p1863_p5 = pnand %p1862_p2, %p1856_p8 }
 0x5f8   : > { %v929_v2 = vpop.xlane.xlu1 %928 }
 0x5f9   : > { %1729 = vrcp.f32 %v929_v2 }
 0x5fc   : > { %v768_v3 = vpop.permute.xlu1 %767 }
 0x5fd   : > { %1576 = vmatpush3.msra.mxu1 %v768_v3 }
 0x5fe   : > { %1585 = vmatprep.subr.mxu1 %v1973_v1 }
 0x603   : > { %v1730_v6 = vpop.eup %1729 }
 0x604   : > { %v931_v12 = vmul.f32 %v1730_v6, %v1724_v53 }
 0x609   : > { %v1095_v4 = vpop.xlane.xlu0 %1094 }
 0x60d   : > { %v934_v13 = vpop.permute.xlu0 %933 }
 0x62d   : > { %v763_v5 = vpop.xlane.xlu1 %762 }
 0x62e   : > { %1731 = vrcp.f32 %v763_v5 }
 0x62f   : > { %1733 = vrcp.f32 %v1095_v4 }
 0x631   : > { %v1100_v16 = vpop.permute.xlu1 %1099 }
 0x638   : > { %v1732_v7 = vpop.eup %1731 }
 0x639   : > { %v765_v9 = vmul.f32 %v1732_v7, %v1728_v62  ;;  %v1734_v10 = vpop.eup %1733 }
 0x63a   : > { %v1097_v14 = vmul.f32 %v1734_v10, %v1726_v58 }
 0x63b   : > { %v766_v11 = vadd.f32 %v765_v9, %v2316_v34  ;;  %1578 = vmatmul.mubr.msk.f32.vlgmr.msra.gmra.mrb[6].mxu1 %vm513_vm2, %v765_v9 }
 0x63c   : > { %1586 = vmatpush3.msra.mxu1 %v934_v13  ;;  %1587 = vmatprep.mubr.msk.f32.mxu1 %vm1972_vm0, %v1973_v1 }
 0x63d   : > { %v932_v15 = vadd.f32 %v931_v12, %v766_v11  ;;  %1595 = vmatprep.subr.mxu1 %v1973_v1 }
 0x63f   : > { %1588 = vmatmul.mubr.msk.f32.vlgmr.msra.gmra.mrb[8].mxu1 %vm513_vm2, %v931_v12  ;;  %v1098_v17 = vadd.f32 %v1097_v14, %v932_v15 }
 0x640   : > { %1596 = vmatpush3.msra.mxu1 %v1100_v16  ;;  %1597 = vmatprep.mubr.msk.f32.mxu1 %vm1972_vm0, %v1973_v1 }
 0x641   : > { %v1308_v18 = vmul.f32 0.25, %v1098_v17 }
 0x643   : > { %1598 = vmatmul.mubr.msk.f32.vlgmr.msra.gmra.mrb[10].mxu1 %vm513_vm2, %v1097_v14  ;;  %1309 = vst.msk [vmem:[%s421_s14] sm:$0xff] %vm513_vm2, %v1308_v18 }
 0x70e   : > { %v839_v25 = vpop.f32.mrb[6].mxu1 }
 0x70f   : > { %1176 = vrot.lane.b32.xlu1 %v839_v25, %s1985_s20  ;;  %v1579_v1 = vpop.f32.mrb[7].mxu1 }
 0x712   : > { %v1005_v26 = vpop.f32.mrb[8].mxu1 }
 0x713   : > { %1180 = vrot.lane.b32.xlu0 %v1005_v26, %s1986_s17  ;;  %v1589_v27 = vpop.f32.mrb[9].mxu1 }
 0x716   : > { %v1171_v28 = vpop.f32.mrb[10].mxu1 }
 0x717   : > { %1184 = vrot.lane.b32.xlu1 %v1171_v28, %s1987_s15  ;;  %v1599_v29 = vpop.f32.mrb[11].mxu1 }
 0x781   : > { %v1177_v30 = vpop.permute.xlu1 %1176 }
 0x782   : > { %v1187_v0 = vsel %vm513_vm2, %v2328_v41, %v1177_v30 }
 0x785   : > { %v1181_v31 = vpop.permute.xlu0 %1180 }
 0x786   : > { %v1189_v32 = vsel %vm1188_vm3, %v1187_v0, %v1181_v31 }
 0x789   : > { %v1185_v33 = vpop.permute.xlu1 %1184 }
 0x78a   : > { %v1191_v34 = vsel %vm1190_vm4, %v1189_v32, %v1185_v33 }
 0x78b   : > { %1609 = vmatmul.mubr.msk.f32.vlgmr.msra.gmra.mrb[6].mxu0 %vm434_vm1, %v1191_v34 }
 0x85e   : > { %v1274_v36 = vpop.f32.mrb[6].mxu0 }
 0x85f   : > { %v1275_v37 = vadd.f32 %v1513_v35, %v1274_v36  ;;  %v1610_v38 = vpop.f32.mrb[7].mxu0 }
 0x861   : > { %v1278_v39 = vadd.f32 %v1275_v37, %v2278_v8 }
 0x863   : > { %v1279_v40 = vsel %vm434_vm1, %v1278_v39, 0.0 }
 0x864   : > { %1280 = vadd.xlane.f32.xlu0 %v1279_v40 }
 0x8f1   : > { %v1281_v41 = vpop.xlane.xlu0 %1280 }
 0x8f2   : > { %v1283_v42 = vmul.f32 0.03125, %v1281_v41 }
 0x8f4   : > { %v1284_v43 = vsub.f32 %v1278_v39, %v1283_v42 }
 0x8f6   : > { %v1285_v44 = vmul.f32 %v1284_v43, %v1284_v43 }
 0x8f8   : > { %v1286_v45 = vsel %vm434_vm1, %v1285_v44, 0.0 }
 0x8f9   : > { %1287 = vadd.xlane.f32.xlu1 %v1286_v45 }
 0x8fa   : > { %1866 = shalt.err (!%p1863_p5)
}
 0x8fb   : > { %s1867_s14 = scalar_lea.hbm %s2368_s23, 128  ;;  %s1871_s15 = scalar_lea.hbm %s2456_s9, 256 }
 0x8fc   : > { %p1868_p7 = scmp.ne.s32.totalorder %s2368_s23, %s1867_s14  ;;  %p1872_p1 = scmp.lt.u32.totalorder %s2368_s23, %s2456_s9 }
 0x8fd   : > { %p1873_p6 = scmp.lt.u32.totalorder %s1871_s15, %s1867_s14  ;;  %p1875_p11 = scmp.lt.u32.totalorder %s1867_s14, %s2368_s23 }
 0x8fe   : > { %p1869_p12 = pnand %p1868_p7, %p2499_p3 }
 0x8ff   : > { %p1874_p10 = por %p1873_p6, %p1872_p1 }
 0x900   : > { %p1870_p13 = pneg %p1869_p12 }
 0x901   : > { %p1876_p4 = por %p1875_p11, %p1874_p10 }
 0x903   : > { %p1877_p8 = pnand %p1876_p4, %p1870_p13 }
 0x905   : > { %1880 = shalt.err (!%p1877_p8)
}
 0x906   : > { %1636 = dma.vmem_to_hbm [thread:$0]  (%p2499_p3), %s1343_s27, 128, %s2368_s23, %s1316_s11   ;;  %v1515_v49 = vld [vmem:[%s2453_s6] ss:$0 sm:$0xff] }
 0x907   : > { %v1516_v51 = vld [vmem:[%s2454_s7] ss:$0 sm:$0xff]  ;;  %s414_s18 = scalar_lea.vmem [#allocation9], %s2251_s28  ;;  %s2402_s11 = scalar_lea.hbm %s2455_s8, %s1519_s19 }
 0x908   : > { %s1329_s25 = sshll.u32 %s414_s18, 4  ;;  %s1311_s14 = scalar_lea.sflag [#allocation4], %s2248_s16  ;;  %s2404_s25 = int_to_ptr.vmem [resolvable:$true] %s1329_s25 }
 0x909   : > { %s1881_s20 = scalar_lea.vmem %s2404_s25, 128  ;;  %s1989_s28 = smov [#allocation9]  }
 0x90a   : > { %p1882_p0 = scmp.ne.s32.totalorder %s2404_s25, %s1881_s20  ;;  %s1885_s13 = sshll.u32 %s1989_s28, 4  ;;  %s1886_s13 = int_to_ptr.vmem [resolvable:$false] %s1885_s13 }
 0x90b   : > { %s1887_s17 = scalar_lea.vmem %s1886_s13, 256  ;;  %p1888_p5 = scmp.lt.s32.totalorder %s2404_s25, %s1886_s13 }
 0x90c   : > { %p1883_p9 = pnand %p1882_p0, %p2499_p3  ;;  %p1889_p7 = scmp.lt.s32.totalorder %s1887_s17, %s1881_s20 }
 0x90e   : > { %p1884_p2 = pneg %p1883_p9  ;;  %p1890_p12 = por %p1889_p7, %p1888_p5 }
 0x910   : > { %p1891_p13 = pnand %p1890_p12, %p1884_p2 }
 0x986   : > { %v1288_v8 = vpop.xlane.xlu1 %1287 }
 0x987   : > { %v1289_v46 = vmul.f32 0.03125, %v1288_v8 }
 0x989   : > { %v1290_v47 = vadd.f32 1e-05, %v1289_v46 }
 0x98b   : > { %1735 = vrsqrt.f32 %v1290_v47 }
 0x995   : > { %v1736_v48 = vpop.eup %1735 }
 0x996   : > { %v1292_v50 = vmul.f32 %v1736_v48, %v1284_v43 }
 0x998   : > { %v1299_v52 = vmul.f32 %v1515_v49, %v1292_v50 }
 0x99a   : > { %v1306_v53 = vadd.f32 %v1516_v51, %v1299_v52 }
 0x99c   : > { %1307 = vst.msk [vmem:[%s414_s18] sm:$0xff] %vm434_vm1, %v1306_v53 }
 0x99d   : > { %1894 = shalt.err (!%p1891_p13)
}
 0x99e   : > { %s1895_s16 = scalar_lea.hbm %s2402_s11, 128  ;;  %s1899_s24 = scalar_lea.hbm %s2455_s8, 256 }
 0x99f   : > { %p1896_p1 = scmp.ne.s32.totalorder %s2402_s11, %s1895_s16  ;;  %p1900_p11 = scmp.lt.u32.totalorder %s2402_s11, %s2455_s8 }
 0x9a0   : > { %p1901_p4 = scmp.lt.u32.totalorder %s1899_s24, %s1895_s16  ;;  %p1903_p0 = scmp.lt.u32.totalorder %s1895_s16, %s2402_s11 }
 0x9a1   : > { %p1897_p6 = pnand %p1896_p1, %p2499_p3 }
 0x9a2   : > { %p1902_p8 = por %p1901_p4, %p1900_p11 }
 0x9a3   : > { %p1898_p10 = pneg %p1897_p6 }
 0x9a4   : > { %p1904_p9 = por %p1903_p0, %p1902_p8 }
 0x9a6   : > { %p1905_p2 = pnand %p1904_p9, %p1898_p10 }
 0x9a8   : > { %1908 = shalt.err (!%p1905_p2)
}
 0x9a9   : > { %1635 = dma.vmem_to_hbm [thread:$0]  (%p2499_p3), %s2404_s25, 128, %s2402_s11, %s1311_s14  }
 0x9aa PF: > { %s2500_s12 = sld [smem:[#allocation20_spill]]  ;;  %s2501_s21 = sld [smem:[#allocation19_spill]] }
 0x9ab   : > { %s1354_s1 = sand.u32 1, %s1951_s30  }
 0x9ac   : > { %s1355_s18 = scalar_lea.sflag [#allocation4], %s1354_s1 }
 0x9b0   : > { %p2502_p5 = scmp.ne.s32.totalorder %s2500_s12, 0  ;;  %p2503_p7 = scmp.ge.s32.totalorder %s2501_s21, 2 }
 0x9b2   : > { %p1654_p12 = pnand %p2503_p7, %p2502_p5 }
 0x9b4   : > { %1942 = dma.done.wait (!%p1654_p12), %s1355_s18, 128  }
 0x9b5   : > { %1944 = vsyncadd (!%p1654_p12), %s1355_s18, 4294967168  ;;  %s1364_s23 = scalar_lea.sflag [#allocation11], %s1354_s1 }
 0x9b6   : > { %1946 = dma.done.wait (!%p1654_p12), %s1364_s23, 128  }
 0x9b7   : > { %1948 = vsyncadd (!%p1654_p12), %s1364_s23, 4294967168  ;;  %s2504_s12 = sld [smem:[#allocation21_spill]]  ;;  %s2505_s29 = sld [smem:[#allocation18_spill]] }
 0x9b8   : > { %s2506_s11 = sld [smem:[#allocation22_spill]]  ;;  %s2507_s30 = smov %s1955_s10 }
 0x9bd   : > { %p27_p3 = scmp.ge.s32.totalorder %s2504_s12, 4   ;;  %s2508_s10 = smov %s2505_s29 }
 0x9bf   :  { %29 = sbr.rel (!%p27_p3) target bundleno = 10 (0xa), region = 133 }
 0x9c6   :  { %1369 = vsyncpa [#allocation3], 1 }
 0x9c7   :  { %1371 = vsyncpa [#allocation3 + $0x1], 1 }
 0x9c8   :  { %1372 = vsyncpa [#allocation6], 1 }
 0x9c9   :  { %1373 = vsyncpa [#allocation4], 1 }
 0x9ca   :  { %1375 = vsyncpa [#allocation4 + $0x1], 1 }
 0x9cb   :  { %1376 = vsyncpa [#allocation11], 1 }
 0x9cc   :  { %1378 = vsyncpa [#allocation11 + $0x1], 1 }

</bundles_post_ra>
